<compile_context>
chip_gen: v7x
topology: tpu7x:2x2x1
jax: 0.10.0
libtpu: 0.0.40
codegen_flags: <defaults>
</compile_context>

<pallas_src>
import functools

import jax
import jax.numpy as jnp
from jax.experimental import pallas as pl
from jax.experimental.pallas import tpu as pltpu

_SLAB_COLS = 128   # lane width of the packed parameter slab
_LANES = 128       # TPU lane count (batch-tile granularity)
_ALIGN = 8         # sublane alignment for slab sections


def _round_up(x, m):
    return (x + m - 1) // m * m


# --------------------------------------------------------------------------- #
# Kernel (transposed / lane-dense layout)
# --------------------------------------------------------------------------- #
def mlp_kernel_t(x_ref, p_ref, o_ref, *, dims, offs):
    in_f, h1, h2, out_f = dims
    o_w1, o_b1, o_w2, o_b2, o_w3, o_b3 = offs

    x = x_ref[...]                                    # (in_f, tb)

    # Static, 8-row-aligned slices into the packed parameter slab (VMEM).
    w1 = p_ref[o_w1:o_w1 + h1, :in_f]                 # (h1, in_f)
    b1 = p_ref[o_b1:o_b1 + h1, 0:1]                   # (h1, 1)
    w2 = p_ref[o_w2:o_w2 + h2, :h1]                   # (h2, h1)
    b2 = p_ref[o_b2:o_b2 + h2, 0:1]                   # (h2, 1)
    w3 = p_ref[o_w3:o_w3 + out_f, :h2]                # (out_f, h2)
    b3 = p_ref[o_b3:o_b3 + out_f, 0:1]                # (out_f, 1)

    a1 = jnp.maximum(jnp.dot(w1, x, preferred_element_type=jnp.float32) + b1, 0.0)
    a2 = jnp.maximum(jnp.dot(w2, a1, preferred_element_type=jnp.float32) + b2, 0.0)
    out = jnp.dot(w3, a2, preferred_element_type=jnp.float32) + b3
    o_ref[...] = out.astype(o_ref.dtype)              # (out_f, tb)


# --------------------------------------------------------------------------- #
# Host-side packing + wrappers
# --------------------------------------------------------------------------- #
def pack_params(w1, b1, w2, b2, w3, b3):
    """Pack transposed weights + bias columns into one (rows, 128) f32 slab.

    Weights arrive in (in, out) layout and are stored transposed as (out, in)
    so the kernel computes W^T @ x^T.  Every section starts at a multiple of
    8 rows so the in-kernel slices sit on (8, 128) tile boundaries.
    """
    in_f, h1 = w1.shape
    _, h2 = w2.shape
    _, out_f = w3.shape
    assert max(in_f, h1, h2, out_f) <= _SLAB_COLS

    sections = [w1.T, jnp.reshape(b1, (-1, 1)),
                w2.T, jnp.reshape(b2, (-1, 1)),
                w3.T, jnp.reshape(b3, (-1, 1))]

    offsets = []
    r = 0
    for s in sections:
        offsets.append(r)
        r += _round_up(s.shape[0], _ALIGN)
    rows = _round_up(r, _ALIGN)

    slab = jnp.zeros((rows, _SLAB_COLS), jnp.float32)
    for off, s in zip(offsets, sections):
        slab = slab.at[off:off + s.shape[0], :s.shape[1]].set(s.astype(jnp.float32))

    return slab, (in_f, h1, h2, out_f), tuple(offsets)


def mlp_forward_t(xT, packed, dims, offs, *, tb=16384):
    """Lane-dense entry point: xT (in_f, B) f32 -> out^T (out_f, B) f32."""
    in_f, h1, h2, out_f = dims
    assert xT.shape[0] == in_f
    B = int(xT.shape[1])

    if B <= 2 * _LANES:
        # Single full-extent block (always layout-legal, even for ragged B).
        tb_eff = B
    else:
        # Lane-aligned tile, capped so the batch grid has >= 2 steps (keeps
        # both v7x TensorCores busy) while blocks stay a few hundred KiB.
        tb_eff = min(int(tb), _round_up(-(-B // 2), _LANES))
    grid_len = -(-B // tb_eff)   # cdiv; final block is masked for ragged B

    kernel = functools.partial(mlp_kernel_t, dims=dims, offs=offs)

    return pl.pallas_call(
        kernel,
        out_shape=jax.ShapeDtypeStruct((out_f, B), jnp.float32),
        grid=(grid_len,),
        in_specs=[
            # Batch-tiled activations, batch on the 128-lane axis.
            pl.BlockSpec((in_f, tb_eff), lambda i: (0, i)),
            # Packed weights/biases: constant block index -> fetched once,
            # VMEM-resident across every grid step.
            pl.BlockSpec(packed.shape, lambda i: (0, 0)),
        ],
        out_specs=pl.BlockSpec((out_f, tb_eff), lambda i: (0, i)),
        compiler_params=pltpu.CompilerParams(
            dimension_semantics=("parallel",),  # megacore-shard batch on v7x
        ),
    )(xT, packed)


def mlp_forward(x, packed, dims, offs, *, tb=16384):
    """PyTorch-layout entry: x (B, in_f) -> (B, out_f).

    The two transposes are pure layout plumbing at the XLA boundary; callers
    that already hold feature-major (lane-dense) data should call
    mlp_forward_t directly and skip them.
    """
    return mlp_forward_t(x.T, packed, dims, offs, tb=tb).T


# --------------------------------------------------------------------------- #
# Init + reference
# --------------------------------------------------------------------------- #
def init_linear_params(key, fan_in, fan_out):
    # PyTorch nn.Linear default init: U(-1/sqrt(fan_in), 1/sqrt(fan_in)).
    kw, kb = jax.random.split(key)
    bound = 1.0 / jnp.sqrt(fan_in)
    # Stored as (in, out) so the reference does x @ W (== PyTorch x @ W^T).
    w = jax.random.uniform(kw, (fan_in, fan_out), jnp.float32, -bound, bound)
    b = jax.random.uniform(kb, (1, fan_out), jnp.float32, -bound, bound)
    return w, b


def reference_forward(x, w1, b1, w2, b2, w3, b3):
    a1 = jnp.maximum(x @ w1 + b1, 0.0)
    a2 = jnp.maximum(a1 @ w2 + b2, 0.0)
    return a2 @ w3 + b3


if __name__ == "__main__":
    in_features, h1, h2, out_features = 6, 8, 9, 2

    key = jax.random.PRNGKey(0)
    kx, kx2, k1, k2, k3 = jax.random.split(key, 5)

    w1, b1 = init_linear_params(k1, in_features, h1)
    w2, b2 = init_linear_params(k2, h1, h2)
    w3, b3 = init_linear_params(k3, h2, out_features)
    packed, dims, offs = pack_params(w1, b1, w2, b2, w3, b3)

    # Test 1: small batch -> single full-extent block.
    batch = 64
    x = jax.random.normal(kx, (batch, in_features), jnp.float32)
    out = jax.block_until_ready(mlp_forward(x, packed, dims, offs))
    ref = reference_forward(x, w1, b1, w2, b2, w3, b3)
    assert out.shape == (batch, out_features)
    assert jnp.allclose(out, ref, atol=1e-5, rtol=1e-5)

    # Test 2: ragged batch exercising a 2-step batch grid with a masked
    # (partially out-of-bounds) final block -- no host-side padding.
    batch2 = 300
    x2 = jax.random.normal(kx2, (batch2, in_features), jnp.float32)
    out2 = jax.block_until_ready(mlp_forward(x2, packed, dims, offs))
    ref2 = reference_forward(x2, w1, b1, w2, b2, w3, b3)
    assert out2.shape == (batch2, out_features)
    assert jnp.allclose(out2, ref2, atol=1e-5, rtol=1e-5)

    print("KERNEL_OK")
</pallas_src>

<mosaic_0001>
module attributes {stable_mosaic.version = 11 : i64} {
  func.func @mlp_kernel_t(%arg0: i32, %arg1: memref<6x64xf32, #tpu.memory_space<vmem>>, %arg2: memref<64x128xf32, #tpu.memory_space<vmem>>, %arg3: memref<2x64xf32, #tpu.memory_space<vmem>>) attributes {dimension_semantics = [#tpu.dimension_semantics<parallel>], iteration_bounds = array<i64: 1>, scalar_prefetch = 0 : i64, scratch_operands = 0 : i64, tpu.core_type = #tpu.core_type<tc>, window_params = [{transform_indices = @transform_0, window_bounds = array<i64: 6, 64>}, {pipeline_mode = #tpu.pipeline_mode<synchronous>, transform_indices = @transform_1, window_bounds = array<i64: 64, 128>}, {transform_indices = @transform_2, window_bounds = array<i64: 2, 64>}]} {
    %c0 = arith.constant 0 : index
    %c0_0 = arith.constant 0 : index
    %0 = vector.load %arg1[%c0, %c0_0] : memref<6x64xf32, #tpu.memory_space<vmem>>, vector<6x64xf32>
    %c0_1 = arith.constant 0 : index
    %c0_2 = arith.constant 0 : index
    %1 = vector.load %arg2[%c0_1, %c0_2] : memref<64x128xf32, #tpu.memory_space<vmem>>, vector<8x6xf32>
    %c8 = arith.constant 8 : index
    %c0_3 = arith.constant 0 : index
    %2 = vector.load %arg2[%c8, %c0_3] : memref<64x128xf32, #tpu.memory_space<vmem>>, vector<8x1xf32>
    %c16 = arith.constant 16 : index
    %c0_4 = arith.constant 0 : index
    %3 = vector.load %arg2[%c16, %c0_4] : memref<64x128xf32, #tpu.memory_space<vmem>>, vector<9x8xf32>
    %c32 = arith.constant 32 : index
    %c0_5 = arith.constant 0 : index
    %4 = vector.load %arg2[%c32, %c0_5] : memref<64x128xf32, #tpu.memory_space<vmem>>, vector<9x1xf32>
    %c48 = arith.constant 48 : index
    %c0_6 = arith.constant 0 : index
    %5 = vector.load %arg2[%c48, %c0_6] : memref<64x128xf32, #tpu.memory_space<vmem>>, vector<2x9xf32>
    %c56 = arith.constant 56 : index
    %c0_7 = arith.constant 0 : index
    %6 = vector.load %arg2[%c56, %c0_7] : memref<64x128xf32, #tpu.memory_space<vmem>>, vector<2x1xf32>
    %cst = arith.constant dense<0.000000e+00> : vector<8x64xf32>
    %7 = tpu.matmul %1, %0, %cst {dimension_numbers = #tpu.dot_dimension_numbers<[1], [0], [0], [1], [0, 0, 1, 1], [], []>} : vector<8x6xf32>, vector<6x64xf32>, vector<8x64xf32> -> vector<8x64xf32>
    %8 = vector.broadcast %2 : vector<8x1xf32> to vector<8x64xf32>
    %9 = arith.addf %7, %8 : vector<8x64xf32>
    %cst_8 = arith.constant 0.000000e+00 : f32
    %10 = vector.broadcast %cst_8 : f32 to vector<8x64xf32>
    %11 = arith.maximumf %9, %10 : vector<8x64xf32>
    %cst_9 = arith.constant dense<0.000000e+00> : vector<9x64xf32>
    %12 = tpu.matmul %3, %11, %cst_9 {dimension_numbers = #tpu.dot_dimension_numbers<[1], [0], [0], [1], [0, 0, 1, 1], [], []>} : vector<9x8xf32>, vector<8x64xf32>, vector<9x64xf32> -> vector<9x64xf32>
    %13 = vector.broadcast %4 : vector<9x1xf32> to vector<9x64xf32>
    %14 = arith.addf %12, %13 : vector<9x64xf32>
    %cst_10 = arith.constant 0.000000e+00 : f32
    %15 = vector.broadcast %cst_10 : f32 to vector<9x64xf32>
    %16 = arith.maximumf %14, %15 : vector<9x64xf32>
    %cst_11 = arith.constant dense<0.000000e+00> : vector<2x64xf32>
    %17 = tpu.matmul %5, %16, %cst_11 {dimension_numbers = #tpu.dot_dimension_numbers<[1], [0], [0], [1], [0, 0, 1, 1], [], []>} : vector<2x9xf32>, vector<9x64xf32>, vector<2x64xf32> -> vector<2x64xf32>
    %18 = vector.broadcast %6 : vector<2x1xf32> to vector<2x64xf32>
    %19 = arith.addf %17, %18 : vector<2x64xf32>
    %c0_12 = arith.constant 0 : index
    %c0_13 = arith.constant 0 : index
    %20 = vector.load %arg3[%c0_12, %c0_13] : memref<2x64xf32, #tpu.memory_space<vmem>>, vector<2x64xf32>
    tpu.vector_store %arg3[%c0_12, %c0_13], %19 {strides = array<i32>} : memref<2x64xf32, #tpu.memory_space<vmem>>, vector<2x64xf32>,
    return
  }
  func.func @transform_0(%arg0: i32) -> (i32, i32) {
    %c0_i32 = arith.constant 0 : i32
    %c0_i32_0 = arith.constant 0 : i32
    return %c0_i32, %arg0 : i32, i32
  }
  func.func @transform_1(%arg0: i32) -> (i32, i32) {
    %c0_i32 = arith.constant 0 : i32
    %c0_i32_0 = arith.constant 0 : i32
    %c0_i32_1 = arith.constant 0 : i32
    return %c0_i32, %c0_i32_0 : i32, i32
  }
  func.func @transform_2(%arg0: i32) -> (i32, i32) {
    %c0_i32 = arith.constant 0 : i32
    %c0_i32_0 = arith.constant 0 : i32
    return %c0_i32, %arg0 : i32, i32
  }
}

</mosaic_0001>

<bundles_post_ra>
// kernel: tpu_custom_call.1
= control target key start
LH: loop header
LB: loop body
LE: loop exit
PB: predicated region body
PF: predicated region fallthrough
CT: control target
= control target key end

     0   :  { %7 = vsyncpa [#allocation3], 0  ;;  %s513_s0 = inlined_call_operand.hbm [shape: f32[6,64], index: 0, kind: input, shape index: {}]   ;;  %s514_s1 = inlined_call_operand.hbm [shape: f32[64,128], index: 1, kind: input, shape index: {}]   ;;  %s515_s2 = inlined_call_operand.hbm [shape: f32[2,64], index: 2, kind: output, shape index: {}]  }
   0x1   :  { %8 = vsyncpa [#allocation6], 0 }
   0x2   :  { %9 = vsyncpa [#allocation4], 0  ;;  %s445_s9 = smov [#allocation2]   ;;  %s446_s11 = smov [#allocation5]  }
   0x3   :  { %s16_s10 = sshll.u32 %s445_s9, 4  ;;  %s25_s12 = sshll.u32 %s446_s11, 4  ;;  %s17_s10 = int_to_ptr.vmem [resolvable:$true] %s16_s10  ;;  %s470_s12 = int_to_ptr.vmem [resolvable:$true] %s25_s12 }
   0x4   :  { %s373_s15 = scalar_lea.hbm %s513_s0, 128 }
   0x5   :  { %p374_p0 = scmp.ne.s32.totalorder %s513_s0, %s373_s15  ;;  %p377_p1 = scmp.lt.u32.totalorder %s373_s15, %s513_s0 }
   0x7   :  { %p379_p2 = pnand %p377_p1, %p374_p0 }
   0x9   :  { %382 = shalt.err (!%p379_p2)
}
   0xa   :  { %s383_s20 = scalar_lea.vmem %s17_s10, 128  ;;  %p388_p4 = scmp.lt.s32.totalorder %s17_s10, %s17_s10 }
   0xb   :  { %p384_p3 = scmp.ne.s32.totalorder %s17_s10, %s383_s20  ;;  %p389_p5 = scmp.lt.s32.totalorder %s383_s20, %s383_s20 }
   0xd   :  { %p390_p6 = por %p389_p5, %p388_p4 }
   0xf   :  { %p391_p7 = pnand %p390_p6, %p384_p3 }
  0x11   :  { %394 = shalt.err (!%p391_p7)
}
  0x12   :  { %19 = dma.hbm_to_vmem [thread:$0]  %s513_s0, 128, %s17_s10, [#allocation3]  }
  0x13   :  { %s395_s25 = scalar_lea.hbm %s514_s1, 1024 }
  0x14   :  { %p396_p8 = scmp.ne.s32.totalorder %s514_s1, %s395_s25  ;;  %p399_p9 = scmp.lt.u32.totalorder %s395_s25, %s514_s1 }
  0x16   :  { %p401_p10 = pnand %p399_p9, %p396_p8 }
  0x18   :  { %404 = shalt.err (!%p401_p10)
}
  0x19   :  { %s405_s30 = scalar_lea.vmem %s470_s12, 1024  ;;  %p410_p12 = scmp.lt.s32.totalorder %s470_s12, %s470_s12 }
  0x1a   :  { %p406_p11 = scmp.ne.s32.totalorder %s470_s12, %s405_s30  ;;  %p411_p13 = scmp.lt.s32.totalorder %s405_s30, %s405_s30 }
  0x1c   :  { %p412_p0 = por %p411_p13, %p410_p12 }
  0x1e   :  { %p413_p1 = pnand %p412_p0, %p406_p11 }
  0x20   :  { %416 = shalt.err (!%p413_p1)
}
  0x21   :  { %s447_s0 = smov 128   ;;  %s448_s3 = smov 8  }
  0x22   :  { %31 = dma.hbm_to_vmem [thread:$0]  %s514_s1, 1024, %s470_s12, [#allocation6], %s447_s0, %s447_s0, %s448_s3  }
  0x23   :  { %439 = dma.done.wait [#allocation3], 128  }
  0x24   :  { %440 = vsyncadd [#allocation3], 4294967168 }
  0x25   :  { %441 = dma.done.wait [#allocation6], 1024  }
  0x26   :  { %442 = vsyncadd [#allocation6], 4294966272  ;;  %v449_v0 = vmov 0.0   ;;  %vm450_vm0 = vmmov 0   ;;  %v451_v1 = vmov 0   ;;  %vm56_vm1 = vcmask 1045504  }
  0x27   :  { %340 = vmatprep.subr.mxu0 %v449_v0  ;;  %342 = vmatprep.mubr.msk.f32.mxu0 %vm450_vm0, %v449_v0  ;;  %vm52_vm2 = vcmask 48128   ;;  %v38_v2 = vld [vmem:[#allocation2] sm:$0x3f]  ;;  %v39_v3 = vld [vmem:[#allocation5] sm:$0xff]  ;;  %v40_v4 = vld [vmem:[#allocation5 + $0x8] sm:$0xff]  ;;  %vm141_vm3 = vcmask 64512  }
  0x28   :  { %371 = vset.pattern.permute.xlu0 %v451_v1  ;;  %372 = vset.pattern.permute.xlu1 %v451_v1  ;;  %v43_v5 = vld [vmem:[#allocation5 + $0x20] sm:$0xff]  ;;  %v41_v6 = vld [vmem:[#allocation5 + $0x10] sm:$0xff]  ;;  %v44_v7 = vld [vmem:[#allocation5 + $0x28] sm:$0x1]  ;;  %v452_v15 = vmov 0.0|0.0   ;;  %vm234_vm4 = vcmask 1040384  }
  0x29   :  { %341 = vmatpush3.msk.msra.mxu0 %vm56_vm1, %v38_v2  ;;  %49 = vperm.xlu0 %371, %v40_v4   ;;  %v46_v8 = vld [vmem:[#allocation5 + $0x38] sm:$0x3]  ;;  %vm453_vm5 = vmmov 1   ;;  %v45_v25 = vld [vmem:[#allocation5 + $0x30] sm:$0x3]  ;;  %vm230_vm7 = vcmask 72704  }
  0x2a   :  { %343 = vmatmul.mubr.msk.f32.vlgmr.msra.gmra.mrb[0].mxu0 %vm52_vm2, %v39_v3  ;;  %347 = vmatprep.mubr.msk.f32.mxu1 %vm141_vm3, %v41_v6  ;;  %v42_v14 = vld [vmem:[#allocation5 + $0x18] sm:$0x1]  ;;  %vm359_vm6 = vmpackc.low %vm234_vm4, %vm453_vm5  ;;  %s454_s1 = smov [#allocation7]   ;;  %vm308_vm8 = vcmask 517120  }
  0x2b   :  { %354 = vmatprep.mubr.msk.f32.mxu0 %vm450_vm0, %v449_v0  ;;  %138 = vperm.xlu1 %372, %v44_v7   ;;  %s316_s6 = sshll.u32 %s454_s1, 4  ;;  %s317_s6 = int_to_ptr.vmem [resolvable:$true] %s316_s6 }
  0x2c   :  { %357 = vmatprep.subr.bf16.mxu0 %v452_v15  ;;  %s417_s7 = scalar_lea.vmem %s317_s6, 32  ;;  %p422_p3 = scmp.lt.s32.totalorder %s317_s6, %s317_s6 }
  0x2d   :  { %133 = vperm.xlu0 %371, %v43_v5   ;;  %p418_p2 = scmp.ne.s32.totalorder %s317_s6, %s417_s7  ;;  %p423_p4 = scmp.lt.s32.totalorder %s417_s7, %s417_s7 }
  0x2f   :  { %227 = vperm.xlu1 %372, %v46_v8   ;;  %p424_p5 = por %p423_p4, %p422_p3 }
  0x31   :  { %p425_p6 = pnand %p424_p5, %p418_p2 }
  0xa8   :  { %v50_v9 = vpop.permute.xlu0 %49 }
  0xaa   :  { %v139_v16 = vpop.permute.xlu1 %138 }
  0xac   :  { %v134_v18 = vpop.permute.xlu0 %133 }
  0xae   :  { %v228_v26 = vpop.permute.xlu1 %227 }
  0xfd   :  { %v126_v10 = vpop.f32.mrb[0].mxu0 }
  0xfe   :  { %v127_v11 = vadd.f32 %v126_v10, %v50_v9  ;;  %v344_v12 = vpop.f32.mrb[1].mxu0 }
 0x100   :  { %v130_v13 = vmax.f32 %v127_v11, 0.0 }
 0x102   :  { %345 = vmatprep.subr.mxu1 %v130_v13 }
 0x103   :  { %346 = vmatpush3.msra.mxu1 %v130_v13 }
 0x104   :  { %348 = vmatmul.mubr.msk.f32.vlgmr.msra.gmra.mrb[0].mxu1 %vm141_vm3, %v42_v14 }
 0x1d7   :  { %v349_v17 = vpop.f32.mrb[0].mxu1 }
 0x1d8   :  { %v220_v19 = vadd.f32 %v349_v17, %v139_v16  ;;  %v214_v20 = vpop.f32.mrb[1].mxu1 }
 0x1d9   :  { %v215_v21 = vadd.f32 %v214_v20, %v134_v18 }
 0x1da   :  { %v224_v22 = vmax.f32 %v220_v19, 0.0 }
 0x1db   :  { %v223_v23 = vmax.f32 %v215_v21, 0.0 }
 0x1dd   :  { %v358_v24 = vpack.c.bf16 %v224_v22, %v223_v23 }
 0x1df   :  { %360 = vmatpush3.bf16.msk.msra.mxu0 %vm359_vm6, %v358_v24 }
 0x1e2   :  { %355 = vmatmul.mubr.msk.f32.vlgmr.msra.gmra.mrb[2].mxu0 %vm230_vm7, %v45_v25 }
 0x2b5   :  { %v304_v27 = vpop.f32.mrb[2].mxu0 }
 0x2b6   :  { %v305_v28 = vadd.f32 %v304_v27, %v228_v26  ;;  %v356_v29 = vpop.f32.mrb[3].mxu0 }
 0x2b8   :  { %309 = vst.msk [vmem:[#allocation7] sm:$0x3] %vm308_vm8, %v305_v28 }
 0x2b9   :  { %428 = shalt.err (!%p425_p6)
}
 0x2ba   :  { %s429_s10 = scalar_lea.hbm %s515_s2, 32 }
 0x2bb   :  { %p430_p7 = scmp.ne.s32.totalorder %s515_s2, %s429_s10  ;;  %p433_p8 = scmp.lt.u32.totalorder %s429_s10, %s515_s2 }
 0x2bd   :  { %p435_p9 = pnand %p433_p8, %p430_p7 }
 0x2bf   :  { %438 = shalt.err (!%p435_p9)
}
 0x2c0   :  { %319 = dma.vmem_to_hbm [thread:$0]  %s317_s6, 32, %s515_s2, [#allocation4]  }
 0x2c1   :  { %443 = dma.done.wait [#allocation4], 32  }
 0x2c2   :  { %444 = vsyncadd [#allocation4], 4294967264 }
 0x2c3   :  { %323 = vsyncpa [#allocation3], 1 }
 0x2c4   :  { %324 = vsyncpa [#allocation6], 1 }
 0x2c5   :  { %325 = vsyncpa [#allocation4], 1 }

</bundles_post_ra>
